<compile_context>
chip_gen: v6e
topology: v6e:2x2x1
jax: 0.10.0
libtpu: 0.0.40
codegen_flags: <defaults>
</compile_context>

<pallas_src>
import functools

import jax
import jax.numpy as jnp
from jax.experimental import pallas as pl
from jax.experimental.pallas import tpu as pltpu


def _fused_mlp_kernel(*refs, num_layers, neg_slope):
    """Whole MLP in one kernel body.

    refs layout:
      [0]                         x tile            (tm, K0)       VMEM (auto)
      [1 .. L]                    W_l               (K_l, N_l)     HBM (pl.ANY)
      [L+1 .. 2L]                 b_l               (1, N_l)       VMEM (auto)
      [2L+1]                      out tile          (tm, N_last)   VMEM (auto)
      [2L+2 .. 3L+1]              W_l VMEM scratch  (K_l, N_l)
      [3L+2]                      DMA semaphores    (L,)
    """
    L = num_layers
    x_ref = refs[0]
    w_hbm = refs[1:1 + L]
    b_refs = refs[1 + L:1 + 2 * L]
    o_ref = refs[1 + 2 * L]
    w_vmem = refs[2 + 2 * L:2 + 3 * L]
    sem = refs[2 + 3 * L]

    is_first = pl.program_id(0) == 0

    # Issue all weight DMAs back-to-back on the first grid step only; the VMEM
    # weight scratch persists across the (sequential, "arbitrary") M blocks,
    # so weights hit HBM exactly once per call.
    @pl.when(is_first)
    def _start_weight_dmas():
        for l in range(L):
            pltpu.make_async_copy(w_hbm[l], w_vmem[l], sem.at[l]).start()

    h = x_ref[...].astype(jnp.float32)  # intermediate stays f32 inside the kernel
    for l in range(L):
        @pl.when(is_first)
        def _wait_weight(l=l):
            pltpu.make_async_copy(w_hbm[l], w_vmem[l], sem.at[l]).wait()

        y = jnp.dot(
            h.astype(w_vmem[l].dtype),          # bf16 MXU operands
            w_vmem[l][...],
            preferred_element_type=jnp.float32,  # f32 accumulate
        )
        y = y + b_refs[l][...].astype(jnp.float32)
        if l < L - 1:
            y = jnp.where(y >= 0, y, neg_slope * y)  # LeakyReLU(0.2)
            # TODO(synk): Dropout(0.1) is identity in eval mode.
        h = y

    o_ref[...] = h.astype(o_ref.dtype)


def _choose_tm(m_padded):
    """m_padded is a multiple of 16; single block when small, else a big divisor."""
    if m_padded <= 512:
        return m_padded
    for cand in (512, 256, 128, 64, 32, 16):
        if m_padded % cand == 0:
            return cand
    return 16  # unreachable: m_padded is a multiple of 16


def _vmem_limit_bytes():
    """Generation-aware VMEM budget: min(0.7 * physical VMEM, 64 MiB)."""
    cap = 64 * 1024 * 1024
    try:
        cap = int(getattr(pltpu.get_tpu_info(), "vmem_capacity_bytes", cap))
    except Exception:
        pass
    return min(int(0.7 * cap), 64 * 1024 * 1024)


def transfer_model_forward(x, params, *, neg_slope=0.2):
    """Fused MLP forward: one pallas_call for the whole network.

    x: (M, K0) bf16.  params: list of (W, b), W stored as (in, out) bf16.
    """
    num_layers = len(params)
    assert num_layers >= 1
    M, K0 = x.shape
    ws = [w for (w, _) in params]
    bs = [b.reshape(1, -1) for (_, b) in params]

    d_in = K0
    for w, b in zip(ws, bs):
        assert w.shape[0] == d_in and b.shape == (1, w.shape[1]), (w.shape, b.shape)
        d_in = w.shape[1]
    n_out = ws[-1].shape[1]

    # Pad batch to a multiple of 16 (bf16 packs 16 rows per sublane group).
    Mp = max(16, ((M + 15) // 16) * 16)
    xp = x if Mp == M else jnp.pad(x, ((0, Mp - M), (0, 0)))
    tm = _choose_tm(Mp)

    kernel = functools.partial(
        _fused_mlp_kernel, num_layers=num_layers, neg_slope=neg_slope
    )

    flops = sum(2 * Mp * w.shape[0] * w.shape[1] for w in ws)
    bytes_accessed = (
        xp.size * xp.dtype.itemsize
        + sum(w.size * w.dtype.itemsize for w in ws)      # weights fetched once
        + sum(b.size * b.dtype.itemsize for b in bs)
        + Mp * n_out * x.dtype.itemsize
    )
    cost = pl.CostEstimate(
        flops=flops, transcendentals=0, bytes_accessed=bytes_accessed
    )

    in_specs = (
        [pl.BlockSpec((tm, K0), lambda i: (i, 0))]                      # x tile
        + [pl.BlockSpec(memory_space=pl.ANY) for _ in ws]               # weights in HBM
        + [pl.BlockSpec((1, b.shape[1]), lambda i: (0, 0)) for b in bs] # biases (constant idx)
    )
    out_spec = pl.BlockSpec((tm, n_out), lambda i: (i, 0))
    scratch_shapes = [pltpu.VMEM(w.shape, w.dtype) for w in ws] + [
        pltpu.SemaphoreType.DMA((num_layers,))
    ]

    out = pl.pallas_call(
        kernel,
        out_shape=jax.ShapeDtypeStruct((Mp, n_out), x.dtype),
        grid_spec=pltpu.PrefetchScalarGridSpec(
            num_scalar_prefetch=0,
            grid=(Mp // tm,),
            in_specs=in_specs,
            out_specs=out_spec,
            scratch_shapes=scratch_shapes,
        ),
        compiler_params=pltpu.CompilerParams(
            # "arbitrary": M blocks run sequentially on one core so the weights
            # DMA'd at program 0 can be reused by every later M block.
            dimension_semantics=("arbitrary",),
            vmem_limit_bytes=_vmem_limit_bytes(),
        ),
        cost_estimate=cost,
    )(xp, *ws, *bs)

    return out[:M] if Mp != M else out


def init_transfer_model_params(key, layer_num, inp_dim, emb_dim, dtype=jnp.bfloat16):
    """Mirror of the nn.Linear shapes in transfer_model.__init__.

    W stored as (in, out) (transposed from nn.Linear's (out, in)).
    NOTE: the PyTorch module hardcodes inp_dim=1024 in __init__; here the
    passed inp_dim is honoured so the test can run at a scaled-down size.
    """
    params = []
    d_in = inp_dim
    for i in range(layer_num):
        d_out = emb_dim if i == layer_num - 1 else emb_dim * 2
        key, kw, kb = jax.random.split(key, 3)
        bound = 1.0 / float(d_in) ** 0.5  # PyTorch default uniform(-1/sqrt(fan_in), ...)
        w = jax.random.uniform(kw, (d_in, d_out), jnp.float32, -bound, bound)
        b = jax.random.uniform(kb, (d_out,), jnp.float32, -bound, bound)
        params.append((w.astype(dtype), b.astype(dtype)))
        d_in = d_out
    return params


def _reference_forward(x, params, *, neg_slope=0.2):
    """Pure-JAX reference mirroring the kernel numerics (bf16 dot inputs, f32 acc)."""
    h = x.astype(jnp.float32)
    L = len(params)
    for l, (w, b) in enumerate(params):
        y = jnp.dot(h.astype(w.dtype), w, preferred_element_type=jnp.float32)
        y = y + b.astype(jnp.float32).reshape(1, -1)
        if l < L - 1:
            y = jnp.where(y >= 0, y, neg_slope * y)
        h = y
    return h.astype(x.dtype)


if __name__ == "__main__":
    # Small shapes consistent with the module (scaled down from 1024):
    layer_num = 3
    inp_dim = 128
    emb_dim = 128      # hidden width = 2 * emb_dim = 256
    batch = 8

    key = jax.random.PRNGKey(0)
    key, kx = jax.random.split(key)
    x = jax.random.normal(kx, (batch, inp_dim), jnp.float32).astype(jnp.bfloat16)

    params = init_transfer_model_params(key, layer_num, inp_dim, emb_dim)

    out = transfer_model_forward(x, params)
    out = jax.block_until_ready(out)

    ref = _reference_forward(x, params)
    assert out.shape == (batch, emb_dim), out.shape
    assert jnp.allclose(
        out.astype(jnp.float32), ref.astype(jnp.float32), atol=5e-2, rtol=5e-2
    ), "mismatch vs. reference"

    print("KERNEL_OK")
</pallas_src>

<mosaic_0001>
module attributes {stable_mosaic.version = 11 : i64} {
  func.func @_fused_mlp_kernel(%arg0: i32, %arg1: memref<16x128xbf16, #tpu.memory_space<vmem>>, %arg2: memref<128x256xbf16, #tpu.memory_space<any>>, %arg3: memref<256x256xbf16, #tpu.memory_space<any>>, %arg4: memref<256x128xbf16, #tpu.memory_space<any>>, %arg5: memref<1x256xbf16, #tpu.memory_space<vmem>>, %arg6: memref<1x256xbf16, #tpu.memory_space<vmem>>, %arg7: memref<1x128xbf16, #tpu.memory_space<vmem>>, %arg8: memref<16x128xbf16, #tpu.memory_space<vmem>>, %arg9: memref<128x256xbf16, #tpu.memory_space<vmem>>, %arg10: memref<256x256xbf16, #tpu.memory_space<vmem>>, %arg11: memref<256x128xbf16, #tpu.memory_space<vmem>>, %arg12: memref<3x!tpu.dma_semaphore, #tpu.memory_space<semaphore_mem>>) attributes {dimension_semantics = [#tpu.dimension_semantics<arbitrary>], iteration_bounds = array<i64: 1>, scalar_prefetch = 0 : i64, scratch_operands = 4 : i64, tpu.core_type = #tpu.core_type<tc>, window_params = [{transform_indices = @transform_0, window_bounds = array<i64: 16, 128>}, {}, {}, {}, {pipeline_mode = #tpu.pipeline_mode<synchronous>, transform_indices = @transform_4, window_bounds = array<i64: 1, 256>}, {pipeline_mode = #tpu.pipeline_mode<synchronous>, transform_indices = @transform_5, window_bounds = array<i64: 1, 256>}, {pipeline_mode = #tpu.pipeline_mode<synchronous>, transform_indices = @transform_6, window_bounds = array<i64: 1, 128>}, {transform_indices = @transform_7, window_bounds = array<i64: 16, 128>}]} {
    %c0_i32 = arith.constant 0 : i32
    %0 = arith.cmpi eq, %arg0, %c0_i32 : i32
    %1 = arith.extui %0 : i1 to i32
    %c0_i32_0 = arith.constant 0 : i32
    %2 = arith.cmpi ne, %1, %c0_i32_0 : i32
    scf.if %2 {
      %c0_i32_25 = arith.constant 0 : i32
      %44 = tpu.memref_slice %arg12[%c0_i32_25] : memref<3x!tpu.dma_semaphore, #tpu.memory_space<semaphore_mem>> -> memref<1x!tpu.dma_semaphore, #tpu.memory_space<semaphore_mem>>
      %45 = tpu.memref_squeeze %44 : memref<1x!tpu.dma_semaphore, #tpu.memory_space<semaphore_mem>> -> memref<!tpu.dma_semaphore, #tpu.memory_space<semaphore_mem>>
      tpu.enqueue_dma source(%arg2 : memref<128x256xbf16, #tpu.memory_space<any>>) target(%arg9 : memref<128x256xbf16, #tpu.memory_space<vmem>>) target_semaphore(%45 : memref<!tpu.dma_semaphore, #tpu.memory_space<semaphore_mem>>)
      %c1_i32 = arith.constant 1 : i32
      %46 = tpu.memref_slice %arg12[%c1_i32] : memref<3x!tpu.dma_semaphore, #tpu.memory_space<semaphore_mem>> -> memref<1x!tpu.dma_semaphore, #tpu.memory_space<semaphore_mem>>
      %47 = tpu.memref_squeeze %46 : memref<1x!tpu.dma_semaphore, #tpu.memory_space<semaphore_mem>> -> memref<!tpu.dma_semaphore, #tpu.memory_space<semaphore_mem>>
      tpu.enqueue_dma source(%arg3 : memref<256x256xbf16, #tpu.memory_space<any>>) target(%arg10 : memref<256x256xbf16, #tpu.memory_space<vmem>>) target_semaphore(%47 : memref<!tpu.dma_semaphore, #tpu.memory_space<semaphore_mem>>)
      %c2_i32 = arith.constant 2 : i32
      %48 = tpu.memref_slice %arg12[%c2_i32] : memref<3x!tpu.dma_semaphore, #tpu.memory_space<semaphore_mem>> -> memref<1x!tpu.dma_semaphore, #tpu.memory_space<semaphore_mem>>
      %49 = tpu.memref_squeeze %48 : memref<1x!tpu.dma_semaphore, #tpu.memory_space<semaphore_mem>> -> memref<!tpu.dma_semaphore, #tpu.memory_space<semaphore_mem>>
      tpu.enqueue_dma source(%arg4 : memref<256x128xbf16, #tpu.memory_space<any>>) target(%arg11 : memref<256x128xbf16, #tpu.memory_space<vmem>>) target_semaphore(%49 : memref<!tpu.dma_semaphore, #tpu.memory_space<semaphore_mem>>)
    } else {
    }
    %c0 = arith.constant 0 : index
    %c0_1 = arith.constant 0 : index
    %3 = vector.load %arg1[%c0, %c0_1] : memref<16x128xbf16, #tpu.memory_space<vmem>>, vector<16x128xbf16>
    %4 = arith.extf %3 : vector<16x128xbf16> to vector<16x128xf32>
    %5 = arith.extui %0 : i1 to i32
    %c0_i32_2 = arith.constant 0 : i32
    %6 = arith.cmpi ne, %5, %c0_i32_2 : i32
    scf.if %6 {
      %c0_i32_25 = arith.constant 0 : i32
      %44 = tpu.memref_slice %arg12[%c0_i32_25] : memref<3x!tpu.dma_semaphore, #tpu.memory_space<semaphore_mem>> -> memref<1x!tpu.dma_semaphore, #tpu.memory_space<semaphore_mem>>
      %45 = tpu.memref_squeeze %44 : memref<1x!tpu.dma_semaphore, #tpu.memory_space<semaphore_mem>> -> memref<!tpu.dma_semaphore, #tpu.memory_space<semaphore_mem>>
      tpu.wait_dma2 semaphore(%45 : memref<!tpu.dma_semaphore, #tpu.memory_space<semaphore_mem>>) src(%arg2 : memref<128x256xbf16, #tpu.memory_space<any>>) dst(%arg9 : memref<128x256xbf16, #tpu.memory_space<vmem>>)
    } else {
    }
    %7 = arith.truncf %4 : vector<16x128xf32> to vector<16x128xbf16>
    %c0_3 = arith.constant 0 : index
    %c0_4 = arith.constant 0 : index
    %8 = vector.load %arg9[%c0_3, %c0_4] : memref<128x256xbf16, #tpu.memory_space<vmem>>, vector<128x256xbf16>
    %cst = arith.constant dense<0.000000e+00> : vector<16x256xf32>
    %9 = tpu.matmul %7, %8, %cst {dimension_numbers = #tpu.dot_dimension_numbers<[1], [0], [0], [1], [0, 0, 1, 1], [], []>} : vector<16x128xbf16>, vector<128x256xbf16>, vector<16x256xf32> -> vector<16x256xf32>
    %c0_5 = arith.constant 0 : index
    %c0_6 = arith.constant 0 : index
    %10 = vector.load %arg5[%c0_5, %c0_6] : memref<1x256xbf16, #tpu.memory_space<vmem>>, vector<1x256xbf16>
    %11 = arith.extf %10 : vector<1x256xbf16> to vector<1x256xf32>
    %12 = vector.broadcast %11 : vector<1x256xf32> to vector<16x256xf32>
    %13 = arith.addf %9, %12 : vector<16x256xf32>
    %cst_7 = arith.constant 0.000000e+00 : f32
    %14 = vector.broadcast %cst_7 : f32 to vector<16x256xf32>
    %15 = arith.cmpf oge, %13, %14 : vector<16x256xf32>
    %cst_8 = arith.constant 2.000000e-01 : f32
    %16 = vector.broadcast %cst_8 : f32 to vector<16x256xf32>
    %17 = arith.mulf %16, %13 : vector<16x256xf32>
    %18 = arith.select %15, %13, %17 : vector<16x256xi1>, vector<16x256xf32>
    %19 = arith.extui %0 : i1 to i32
    %c0_i32_9 = arith.constant 0 : i32
    %20 = arith.cmpi ne, %19, %c0_i32_9 : i32
    scf.if %20 {
      %c1_i32 = arith.constant 1 : i32
      %44 = tpu.memref_slice %arg12[%c1_i32] : memref<3x!tpu.dma_semaphore, #tpu.memory_space<semaphore_mem>> -> memref<1x!tpu.dma_semaphore, #tpu.memory_space<semaphore_mem>>
      %45 = tpu.memref_squeeze %44 : memref<1x!tpu.dma_semaphore, #tpu.memory_space<semaphore_mem>> -> memref<!tpu.dma_semaphore, #tpu.memory_space<semaphore_mem>>
      tpu.wait_dma2 semaphore(%45 : memref<!tpu.dma_semaphore, #tpu.memory_space<semaphore_mem>>) src(%arg3 : memref<256x256xbf16, #tpu.memory_space<any>>) dst(%arg10 : memref<256x256xbf16, #tpu.memory_space<vmem>>)
    } else {
    }
    %21 = arith.truncf %18 : vector<16x256xf32> to vector<16x256xbf16>
    %c0_10 = arith.constant 0 : index
    %c0_11 = arith.constant 0 : index
    %22 = vector.load %arg10[%c0_10, %c0_11] : memref<256x256xbf16, #tpu.memory_space<vmem>>, vector<256x256xbf16>
    %cst_12 = arith.constant dense<0.000000e+00> : vector<16x256xf32>
    %23 = tpu.matmul %21, %22, %cst_12 {dimension_numbers = #tpu.dot_dimension_numbers<[1], [0], [0], [1], [0, 0, 1, 1], [], []>} : vector<16x256xbf16>, vector<256x256xbf16>, vector<16x256xf32> -> vector<16x256xf32>
    %c0_13 = arith.constant 0 : index
    %c0_14 = arith.constant 0 : index
    %24 = vector.load %arg6[%c0_13, %c0_14] : memref<1x256xbf16, #tpu.memory_space<vmem>>, vector<1x256xbf16>
    %25 = arith.extf %24 : vector<1x256xbf16> to vector<1x256xf32>
    %26 = vector.broadcast %25 : vector<1x256xf32> to vector<16x256xf32>
    %27 = arith.addf %23, %26 : vector<16x256xf32>
    %cst_15 = arith.constant 0.000000e+00 : f32
    %28 = vector.broadcast %cst_15 : f32 to vector<16x256xf32>
    %29 = arith.cmpf oge, %27, %28 : vector<16x256xf32>
    %cst_16 = arith.constant 2.000000e-01 : f32
    %30 = vector.broadcast %cst_16 : f32 to vector<16x256xf32>
    %31 = arith.mulf %30, %27 : vector<16x256xf32>
    %32 = arith.select %29, %27, %31 : vector<16x256xi1>, vector<16x256xf32>
    %33 = arith.extui %0 : i1 to i32
    %c0_i32_17 = arith.constant 0 : i32
    %34 = arith.cmpi ne, %33, %c0_i32_17 : i32
    scf.if %34 {
      %c2_i32 = arith.constant 2 : i32
      %44 = tpu.memref_slice %arg12[%c2_i32] : memref<3x!tpu.dma_semaphore, #tpu.memory_space<semaphore_mem>> -> memref<1x!tpu.dma_semaphore, #tpu.memory_space<semaphore_mem>>
      %45 = tpu.memref_squeeze %44 : memref<1x!tpu.dma_semaphore, #tpu.memory_space<semaphore_mem>> -> memref<!tpu.dma_semaphore, #tpu.memory_space<semaphore_mem>>
      tpu.wait_dma2 semaphore(%45 : memref<!tpu.dma_semaphore, #tpu.memory_space<semaphore_mem>>) src(%arg4 : memref<256x128xbf16, #tpu.memory_space<any>>) dst(%arg11 : memref<256x128xbf16, #tpu.memory_space<vmem>>)
    } else {
    }
    %35 = arith.truncf %32 : vector<16x256xf32> to vector<16x256xbf16>
    %c0_18 = arith.constant 0 : index
    %c0_19 = arith.constant 0 : index
    %36 = vector.load %arg11[%c0_18, %c0_19] : memref<256x128xbf16, #tpu.memory_space<vmem>>, vector<256x128xbf16>
    %cst_20 = arith.constant dense<0.000000e+00> : vector<16x128xf32>
    %37 = tpu.matmul %35, %36, %cst_20 {dimension_numbers = #tpu.dot_dimension_numbers<[1], [0], [0], [1], [0, 0, 1, 1], [], []>} : vector<16x256xbf16>, vector<256x128xbf16>, vector<16x128xf32> -> vector<16x128xf32>
    %c0_21 = arith.constant 0 : index
    %c0_22 = arith.constant 0 : index
    %38 = vector.load %arg7[%c0_21, %c0_22] : memref<1x128xbf16, #tpu.memory_space<vmem>>, vector<1x128xbf16>
    %39 = arith.extf %38 : vector<1x128xbf16> to vector<1x128xf32>
    %40 = vector.broadcast %39 : vector<1x128xf32> to vector<16x128xf32>
    %41 = arith.addf %37, %40 : vector<16x128xf32>
    %42 = arith.truncf %41 : vector<16x128xf32> to vector<16x128xbf16>
    %c0_23 = arith.constant 0 : index
    %c0_24 = arith.constant 0 : index
    %43 = vector.load %arg8[%c0_23, %c0_24] : memref<16x128xbf16, #tpu.memory_space<vmem>>, vector<16x128xbf16>
    tpu.vector_store %arg8[%c0_23, %c0_24], %42 {strides = array<i32>} : memref<16x128xbf16, #tpu.memory_space<vmem>>, vector<16x128xbf16>,
    return
  }
  func.func @transform_0(%arg0: i32) -> (i32, i32) {
    %c0_i32 = arith.constant 0 : i32
    %c0_i32_0 = arith.constant 0 : i32
    return %arg0, %c0_i32 : i32, i32
  }
  func.func @transform_4(%arg0: i32) -> (i32, i32) {
    %c0_i32 = arith.constant 0 : i32
    %c0_i32_0 = arith.constant 0 : i32
    %c0_i32_1 = arith.constant 0 : i32
    return %c0_i32, %c0_i32_0 : i32, i32
  }
  func.func @transform_5(%arg0: i32) -> (i32, i32) {
    %c0_i32 = arith.constant 0 : i32
    %c0_i32_0 = arith.constant 0 : i32
    %c0_i32_1 = arith.constant 0 : i32
    return %c0_i32, %c0_i32_0 : i32, i32
  }
  func.func @transform_6(%arg0: i32) -> (i32, i32) {
    %c0_i32 = arith.constant 0 : i32
    %c0_i32_0 = arith.constant 0 : i32
    %c0_i32_1 = arith.constant 0 : i32
    return %c0_i32, %c0_i32_0 : i32, i32
  }
  func.func @transform_7(%arg0: i32) -> (i32, i32) {
    %c0_i32 = arith.constant 0 : i32
    %c0_i32_0 = arith.constant 0 : i32
    return %arg0, %c0_i32 : i32, i32
  }
}

</mosaic_0001>

<bundles_post_ra>
// kernel: tpu_custom_call.1
= control target key start
LH: loop header
LB: loop body
LE: loop exit
PB: predicated region body
PF: predicated region fallthrough
CT: control target
= control target key end

     0   :  { %12 = vsyncpa [#allocation7], 0  ;;  %s1178_s0 = inlined_call_operand.hbm [shape: bf16[16,128], index: 0, kind: input, shape index: {}]   ;;  %s1179_s1 = inlined_call_operand.hbm [shape: bf16[128,256], index: 1, kind: input, shape index: {}]   ;;  %s1180_s2 = inlined_call_operand.hbm [shape: bf16[256,256], index: 2, kind: input, shape index: {}]   ;;  %s1181_s3 = inlined_call_operand.hbm [shape: bf16[256,128], index: 3, kind: input, shape index: {}]   ;;  %s1182_s4 = inlined_call_operand.vmem [shape: bf16[1,256], index: 4, kind: input, shape index: {}]   ;;  %s1183_s5 = inlined_call_operand.vmem [shape: bf16[1,256], index: 5, kind: input, shape index: {}]   ;;  %s1184_s6 = inlined_call_operand.vmem [shape: bf16[1,128], index: 6, kind: input, shape index: {}]   ;;  %s1185_s7 = inlined_call_operand.hbm [shape: bf16[16,128], index: 7, kind: output, shape index: {}]  }
   0x1   :  { %13 = vsyncpa [#allocation8], 0  ;;  %s1077_s24 = smov [#allocation6]  }
   0x2   :  { %s19_s25 = sshll.u32 %s1077_s24, 4  ;;  %s20_s25 = int_to_ptr.vmem [resolvable:$true] %s19_s25 }
   0x3   :  { %s975_s26 = scalar_lea.vmem %s20_s25, 128  ;;  %p980_p1 = scmp.lt.s32.totalorder %s20_s25, %s20_s25 }
   0x4   :  { %p976_p0 = scmp.ne.s32.totalorder %s20_s25, %s975_s26  ;;  %p981_p2 = scmp.lt.s32.totalorder %s975_s26, %s975_s26 }
   0x6   :  { %p982_p3 = por %p981_p2, %p980_p1 }
   0x8   :  { %p983_p4 = pnand %p982_p3, %p976_p0 }
   0xa   :  { %986 = shalt.err (!%p983_p4)
}
   0xb   :  { %s1078_s27 = smov 64   ;;  %s1079_s28 = smov 4  }
   0xc   :  { %25 = dma.hbm_to_vmem [thread:$0]  %s1178_s0, 128, %s20_s25, [#allocation7], %s1078_s27, %s1078_s27, %s1079_s28  }
   0xd   :  { %1067 = dma.done.wait [#allocation7], 128  }
   0xe   :  { %1068 = vsyncadd [#allocation7], 4294967168  ;;  %s1080_s8 = smov [#allocation2]   ;;  %s1081_s10 = smov [#allocation3]  }
   0xf   :  { %s47_s9 = sshll.u32 %s1080_s8, 4  ;;  %s59_s11 = sshll.u32 %s1081_s10, 4  ;;  %s48_s9 = int_to_ptr.vmem [resolvable:$true] %s47_s9  ;;  %s60_s11 = int_to_ptr.vmem [resolvable:$true] %s59_s11 }
  0x10   :  { %s995_s12 = scalar_lea.vmem %s48_s9, 2048  ;;  %p1000_p6 = scmp.lt.s32.totalorder %s48_s9, %s48_s9 }
  0x11   :  { %p996_p5 = scmp.ne.s32.totalorder %s48_s9, %s995_s12  ;;  %p1001_p7 = scmp.lt.s32.totalorder %s995_s12, %s995_s12 }
  0x13   :  { %p1002_p8 = por %p1001_p7, %p1000_p6 }
  0x15   :  { %p1003_p9 = pnand %p1002_p8, %p996_p5 }
  0x17   :  { %1006 = shalt.err (!%p1003_p9)  }
  0x18   :  { %50 = dma.hbm_to_vmem [thread:$0]  %s1179_s1, 2048, %s48_s9, [#allocation5] }
  0x19   :  { %s1015_s0 = scalar_lea.vmem %s60_s11, 4096  ;;  %p1020_p11 = scmp.lt.s32.totalorder %s60_s11, %s60_s11 }
  0x1a   :  { %p1016_p10 = scmp.ne.s32.totalorder %s60_s11, %s1015_s0  ;;  %p1021_p12 = scmp.lt.s32.totalorder %s1015_s0, %s1015_s0 }
  0x1c   :  { %p1022_p13 = por %p1021_p12, %p1020_p11 }
  0x1e   :  { %p1023_p0 = pnand %p1022_p13, %p1016_p10 }
  0x20   :  { %1026 = shalt.err (!%p1023_p0)  }
  0x21   :  { %62 = dma.hbm_to_vmem [thread:$0]  %s1180_s2, 4096, %s60_s11, [#allocation5 + $0x1]  ;;  %v75_v0 = vld [vmem:[#allocation6] sm:$0xf]  ;;  %v76_v1 = vld [vmem:[#allocation6 + $0x4] sm:$0xf] }
  0x22   :  { %s1082_s17 = smov [#allocation4]  }
  0x23   :  { %s71_s18 = sshll.u32 %s1082_s17, 4  ;;  %s72_s18 = int_to_ptr.vmem [resolvable:$true] %s71_s18 }
  0x24   :  { %s1035_s19 = scalar_lea.vmem %s72_s18, 2048  ;;  %p1040_p2 = scmp.lt.s32.totalorder %s72_s18, %s72_s18 }
  0x25   :  { %p1036_p1 = scmp.ne.s32.totalorder %s72_s18, %s1035_s19  ;;  %p1041_p3 = scmp.lt.s32.totalorder %s1035_s19, %s1035_s19 }
  0x27   :  { %p1042_p4 = por %p1041_p3, %p1040_p2 }
  0x29   :  { %p1043_p5 = pnand %p1042_p4, %p1036_p1 }
  0x2b   :  { %1046 = shalt.err (!%p1043_p5)  }
  0x2c   :  { %74 = dma.hbm_to_vmem [thread:$0]  %s1181_s3, 2048, %s72_s18, [#allocation5 + $0x2] }
  0x2d   :  { %1069 = dma.done.wait [#allocation5], 2048 }
  0x2e   :  { %1070 = vsyncadd [#allocation5], 4294965248  ;;  %v1083_v2 = vmov 0   ;;  %v879_v3 = vld [vmem:[#allocation2 + $0x74] ss:$8 sps:$4 sm:$0xff]   ;;  %v772_v19 = vcombine.low %v75_v0, %v76_v1  ;;  %v103_v20 = vlaneseq }
  0x2f   :  { %239 = vmatprep.mubr.bf16.mxu0 %v1083_v2  ;;  %v881_v4 = vld [vmem:[#allocation2 + $0x70] ss:$8 sps:$4 sm:$0xff]   ;;  %207 = vmatprep.subr.bf16.mxu0 %v879_v3  ;;  %v882_v5 = vld [vmem:[#allocation2 + $0x64] ss:$8 sps:$4 sm:$0xff]   ;;  %v884_v6 = vld [vmem:[#allocation2 + $0x60] ss:$8 sps:$4 sm:$0xff]  }
  0x30   :  { %208 = vmatpush1.bf16.msra.mxu0 %v881_v4  ;;  %v885_v7 = vld [vmem:[#allocation2 + $0x54] ss:$8 sps:$4 sm:$0xff]   ;;  %v887_v8 = vld [vmem:[#allocation2 + $0x50] ss:$8 sps:$4 sm:$0xff]   ;;  %v888_v9 = vld [vmem:[#allocation2 + $0x44] ss:$8 sps:$4 sm:$0xff]  }
  0x31   :  { %209 = vmatprep.subr.bf16.mxu0 %v882_v5  ;;  %v890_v10 = vld [vmem:[#allocation2 + $0x40] ss:$8 sps:$4 sm:$0xff]   ;;  %v891_v11 = vld [vmem:[#allocation2 + $0x34] ss:$8 sps:$4 sm:$0xff]   ;;  %v893_v12 = vld [vmem:[#allocation2 + $0x30] ss:$8 sps:$4 sm:$0xff]  }
  0x32   :  { %v894_v13 = vld [vmem:[#allocation2 + $0x24] ss:$8 sps:$4 sm:$0xff]   ;;  %v896_v14 = vld [vmem:[#allocation2 + $0x20] ss:$8 sps:$4 sm:$0xff]   ;;  %v897_v15 = vld [vmem:[#allocation2 + $0x14] ss:$8 sps:$4 sm:$0xff]  }
  0x33   :  { %v899_v16 = vld [vmem:[#allocation2 + $0x10] ss:$8 sps:$4 sm:$0xff]   ;;  %v900_v17 = vld [vmem:[#allocation2 + $0x4] ss:$8 sps:$4 sm:$0xff]   ;;  %v902_v18 = vld [vmem:[#allocation2] ss:$8 sps:$4 sm:$0xff]  }
  0x34   :  { %210 = vmatpush1.bf16.msra.mxu0 %v884_v6  ;;  %v1140_v21 = vshrl.u32 %v103_v20, 7  ;;  %v100_v22 = vld [vmem:[%s1182_s4] sm:$0x3] }
  0x35   :  { %211 = vmatprep.subr.bf16.mxu0 %v885_v7  ;;  %v101_v23 = vunpack.c.l.bf16 %v100_v22 }
  0x36   :  { %v1146_v24 = vsub.s32 0, %v1140_v21  ;;  %v109_v25 = vsub.s32 2, %v1140_v21 }
  0x38   :  { %212 = vmatpush1.bf16.msra.mxu0 %v887_v8  ;;  %v106_v26 = vrot.slane %v101_v23, %v1146_v24  ;;  %v110_v27 = vrot.slane %v101_v23, %v109_v25 }
  0x39   :  { %213 = vmatprep.subr.bf16.mxu0 %v888_v9 }
  0x3a   :  { %v116_v28 = vrot.slane %v106_v26, %v1146_v24  ;;  %v120_v29 = vrot.slane %v110_v27, %v1146_v24 }
  0x3c   :  { %214 = vmatpush1.bf16.msra.mxu0 %v890_v10 }
  0x3d   :  { %215 = vmatprep.subr.bf16.mxu0 %v891_v11 }
  0x40   :  { %216 = vmatpush1.bf16.msra.mxu0 %v893_v12 }
  0x41   :  { %217 = vmatprep.subr.bf16.mxu0 %v894_v13 }
  0x44   :  { %218 = vmatpush1.bf16.msra.mxu0 %v896_v14 }
  0x45   :  { %219 = vmatprep.subr.bf16.mxu0 %v897_v15 }
  0x48   :  { %220 = vmatpush1.bf16.msra.mxu0 %v899_v16 }
  0x49   :  { %221 = vmatprep.subr.bf16.mxu0 %v900_v17 }
  0x4c   :  { %222 = vmatpush1.bf16.msra.mxu0 %v902_v18 }
  0x4f   :  { %240 = vmatmul.mubr.bf16.vlgmr.msra.gmra.mxu0 %v772_v19 }
 0x10f   :  { %v241_v30 = vpop.f32.mrf.mxu0 }
 0x110   :  { %v242_v31 = vadd.f32 %v241_v30, %v116_v28 }
 0x111   :  { %v243_v32 = vpop.f32.mrf.mxu0 }
 0x112   :  { %vm250_vm0 = vcmp.ge.f32.partialorder %v242_v31, 0.0  ;;  %v254_v33 = vmul.f32 0.2, %v242_v31  ;;  %v244_v34 = vadd.f32 %v243_v32, %v120_v29 }
 0x113   :  { %v245_v35 = vpop.f32.mrf.mxu0 }
 0x114   :  { %v1154_v36 = vsel %vm250_vm0, %v242_v31, %v254_v33  ;;  %vm251_vm1 = vcmp.ge.f32.partialorder %v244_v34, 0.0  ;;  %v255_v37 = vmul.f32 0.2, %v244_v34  ;;  %v246_v38 = vadd.f32 %v245_v35, %v116_v28 }
 0x115   :  { %v247_v39 = vpop.f32.mrf.mxu0 }
 0x116   :  { %v259_v40 = vsel %vm251_vm1, %v244_v34, %v255_v37  ;;  %vm252_vm2 = vcmp.ge.f32.partialorder %v246_v38, 0.0  ;;  %v256_v41 = vmul.f32 0.2, %v246_v38  ;;  %v248_v42 = vadd.f32 %v247_v39, %v120_v29 }
 0x118   :  { %v1156_v43 = vsel %vm252_vm2, %v246_v38, %v256_v41  ;;  %vm253_vm3 = vcmp.ge.f32.partialorder %v248_v42, 0.0  ;;  %v257_v44 = vmul.f32 0.2, %v248_v42 }
 0x11a   :  { %v261_v45 = vsel %vm253_vm3, %v248_v42, %v257_v44 }
 0x11b   :  { %1071 = dma.done.wait [#allocation5 + $0x1], 4096 }
 0x11c   :  { %1072 = vsyncadd [#allocation5 + $0x1], 4294963200  ;;  %v271_v46 = vpack.c.bf16 %v261_v45, %v259_v40  ;;  %v903_v47 = vld [vmem:[#allocation3 + $0x74] ss:$8 sps:$4 sm:$0xff]   ;;  %v905_v48 = vld [vmem:[#allocation3 + $0x70] ss:$8 sps:$4 sm:$0xff]   ;;  %v270_v15 = vpack.c.bf16 %v1156_v43, %v1154_v36 }
 0x11d   :  { %485 = vmatprep.subr.bf16.mxu1 %v903_v47  ;;  %v906_v49 = vld [vmem:[#allocation3 + $0x64] ss:$8 sps:$4 sm:$0xff]   ;;  %v908_v50 = vld [vmem:[#allocation3 + $0x60] ss:$8 sps:$4 sm:$0xff]   ;;  %v909_v51 = vld [vmem:[#allocation3 + $0x54] ss:$8 sps:$4 sm:$0xff]  }
 0x11e   :  { %517 = vmatprep.mubr.bf16.mxu1 %v271_v46  ;;  %486 = vmatpush1.bf16.msra.mxu1 %v905_v48  ;;  %v911_v52 = vld [vmem:[#allocation3 + $0x50] ss:$8 sps:$4 sm:$0xff]   ;;  %v912_v53 = vld [vmem:[#allocation3 + $0x44] ss:$8 sps:$4 sm:$0xff]   ;;  %v914_v54 = vld [vmem:[#allocation3 + $0x40] ss:$8 sps:$4 sm:$0xff]  }
 0x11f   :  { %487 = vmatprep.subr.bf16.mxu1 %v906_v49  ;;  %v915_v55 = vld [vmem:[#allocation3 + $0x34] ss:$8 sps:$4 sm:$0xff]   ;;  %v917_v56 = vld [vmem:[#allocation3 + $0x30] ss:$8 sps:$4 sm:$0xff]   ;;  %v918_v57 = vld [vmem:[#allocation3 + $0x24] ss:$8 sps:$4 sm:$0xff]  }
 0x120   :  { %v920_v58 = vld [vmem:[#allocation3 + $0x20] ss:$8 sps:$4 sm:$0xff]   ;;  %v921_v59 = vld [vmem:[#allocation3 + $0x14] ss:$8 sps:$4 sm:$0xff]   ;;  %v923_v60 = vld [vmem:[#allocation3 + $0x10] ss:$8 sps:$4 sm:$0xff]  }
 0x121   :  { %v924_v61 = vld [vmem:[#allocation3 + $0x4] ss:$8 sps:$4 sm:$0xff]   ;;  %v926_v62 = vld [vmem:[#allocation3] ss:$8 sps:$4 sm:$0xff]   ;;  %v927_v63 = vld [vmem:[#allocation3 + $0xf4] ss:$8 sps:$4 sm:$0xff]  }
 0x122   :  { %488 = vmatpush1.bf16.msra.mxu1 %v908_v50  ;;  %v929_v0 = vld [vmem:[#allocation3 + $0xf0] ss:$8 sps:$4 sm:$0xff]   ;;  %v930_v1 = vld [vmem:[#allocation3 + $0xe4] ss:$8 sps:$4 sm:$0xff]   ;;  %v932_v2 = vld [vmem:[#allocation3 + $0xe0] ss:$8 sps:$4 sm:$0xff]  }
 0x123   :  { %489 = vmatprep.subr.bf16.mxu1 %v909_v51  ;;  %v933_v3 = vld [vmem:[#allocation3 + $0xd4] ss:$8 sps:$4 sm:$0xff]   ;;  %v935_v4 = vld [vmem:[#allocation3 + $0xd0] ss:$8 sps:$4 sm:$0xff]   ;;  %v936_v5 = vld [vmem:[#allocation3 + $0xc4] ss:$8 sps:$4 sm:$0xff]  }
 0x124   :  { %v938_v6 = vld [vmem:[#allocation3 + $0xc0] ss:$8 sps:$4 sm:$0xff]   ;;  %v939_v7 = vld [vmem:[#allocation3 + $0xb4] ss:$8 sps:$4 sm:$0xff]   ;;  %v941_v8 = vld [vmem:[#allocation3 + $0xb0] ss:$8 sps:$4 sm:$0xff]  }
 0x125   :  { %v942_v9 = vld [vmem:[#allocation3 + $0xa4] ss:$8 sps:$4 sm:$0xff]   ;;  %v944_v10 = vld [vmem:[#allocation3 + $0xa0] ss:$8 sps:$4 sm:$0xff]   ;;  %v945_v11 = vld [vmem:[#allocation3 + $0x94] ss:$8 sps:$4 sm:$0xff]  }
 0x126   :  { %490 = vmatpush1.bf16.msra.mxu1 %v911_v52  ;;  %v947_v12 = vld [vmem:[#allocation3 + $0x90] ss:$8 sps:$4 sm:$0xff]   ;;  %v948_v13 = vld [vmem:[#allocation3 + $0x84] ss:$8 sps:$4 sm:$0xff]   ;;  %v950_v14 = vld [vmem:[#allocation3 + $0x80] ss:$8 sps:$4 sm:$0xff]  }
 0x127   :  { %491 = vmatprep.subr.bf16.mxu1 %v912_v53  ;;  %v304_v16 = vld [vmem:[%s1183_s5] sm:$0x3] }
 0x128   :  { %v305_v17 = vunpack.c.l.bf16 %v304_v16 }
 0x12a   :  { %492 = vmatpush1.bf16.msra.mxu1 %v914_v54  ;;  %v310_v18 = vrot.slane %v305_v17, %v1146_v24  ;;  %v314_v19 = vrot.slane %v305_v17, %v109_v25 }
 0x12b   :  { %493 = vmatprep.subr.bf16.mxu1 %v915_v55 }
 0x12c   :  { %v320_v20 = vrot.slane %v310_v18, %v1146_v24  ;;  %v324_v22 = vrot.slane %v314_v19, %v1146_v24 }
 0x12e   :  { %494 = vmatpush1.bf16.msra.mxu1 %v917_v56 }
 0x12f   :  { %495 = vmatprep.subr.bf16.mxu1 %v918_v57 }
 0x132   :  { %496 = vmatpush1.bf16.msra.mxu1 %v920_v58 }
 0x133   :  { %497 = vmatprep.subr.bf16.mxu1 %v921_v59 }
 0x136   :  { %498 = vmatpush1.bf16.msra.mxu1 %v923_v60 }
 0x137   :  { %499 = vmatprep.subr.bf16.mxu1 %v924_v61 }
 0x13a   :  { %500 = vmatpush1.bf16.msra.mxu1 %v926_v62 }
 0x13b   :  { %501 = vmatprep.subr.bf16.mxu1 %v927_v63 }
 0x13e   :  { %502 = vmatpush2.bf16.msra.mxu1 %v929_v0 }
 0x13f   :  { %503 = vmatprep.subr.bf16.mxu1 %v930_v1 }
 0x142   :  { %504 = vmatpush2.bf16.msra.mxu1 %v932_v2 }
 0x143   :  { %505 = vmatprep.subr.bf16.mxu1 %v933_v3 }
 0x146   :  { %506 = vmatpush2.bf16.msra.mxu1 %v935_v4 }
 0x147   :  { %507 = vmatprep.subr.bf16.mxu1 %v936_v5 }
 0x14a   :  { %508 = vmatpush2.bf16.msra.mxu1 %v938_v6 }
 0x14b   :  { %509 = vmatprep.subr.bf16.mxu1 %v939_v7 }
 0x14e   :  { %510 = vmatpush2.bf16.msra.mxu1 %v941_v8 }
 0x14f   :  { %511 = vmatprep.subr.bf16.mxu1 %v942_v9 }
 0x152   :  { %512 = vmatpush2.bf16.msra.mxu1 %v944_v10 }
 0x153   :  { %513 = vmatprep.subr.bf16.mxu1 %v945_v11 }
 0x156   :  { %514 = vmatpush2.bf16.msra.mxu1 %v947_v12 }
 0x157   :  { %515 = vmatprep.subr.bf16.mxu1 %v948_v13 }
 0x15a   :  { %516 = vmatpush2.bf16.msra.mxu1 %v950_v14 }
 0x15d   :  { %518 = vmatmul.mubr.bf16.vlgmr.msra.gmra.mxu1 %v270_v15 }
 0x21d   :  { %v519_v23 = vpop.f32.mrf.mxu1 }
 0x21e   :  { %v520_v26 = vadd.f32 %v519_v23, %v320_v20 }
 0x21f   :  { %v521_v27 = vpop.f32.mrf.mxu1 }
 0x220   :  { %vm528_vm4 = vcmp.ge.f32.partialorder %v520_v26, 0.0  ;;  %v532_v28 = vmul.f32 0.2, %v520_v26  ;;  %v522_v29 = vadd.f32 %v521_v27, %v324_v22 }
 0x221   :  { %v523_v30 = vpop.f32.mrf.mxu1 }
 0x222   :  { %v536_v31 = vsel %vm528_vm4, %v520_v26, %v532_v28  ;;  %vm529_vm5 = vcmp.ge.f32.partialorder %v522_v29, 0.0  ;;  %v533_v32 = vmul.f32 0.2, %v522_v29  ;;  %v524_v33 = vadd.f32 %v523_v30, %v320_v20 }
 0x223   :  { %v525_v34 = vpop.f32.mrf.mxu1 }
 0x224   :  { %v537_v35 = vsel %vm529_vm5, %v522_v29, %v533_v32  ;;  %vm530_vm6 = vcmp.ge.f32.partialorder %v524_v33, 0.0  ;;  %v534_v21 = vmul.f32 0.2, %v524_v33  ;;  %v526_v25 = vadd.f32 %v525_v34, %v324_v22 }
 0x226   :  { %v538_v36 = vsel %vm530_vm6, %v524_v33, %v534_v21  ;;  %vm531_vm7 = vcmp.ge.f32.partialorder %v526_v25, 0.0  ;;  %v535_v37 = vmul.f32 0.2, %v526_v25 }
 0x228   :  { %v539_v38 = vsel %vm531_vm7, %v526_v25, %v535_v37 }
 0x229   :  { %1073 = dma.done.wait [#allocation5 + $0x2], 2048 }
 0x22a   :  { %1074 = vsyncadd [#allocation5 + $0x2], 4294965248  ;;  %v549_v39 = vpack.c.bf16 %v539_v38, %v537_v35  ;;  %v951_v40 = vld [vmem:[#allocation4 + $0x78] sm:$0xff]   ;;  %v953_v42 = vld [vmem:[#allocation4 + $0x70] sm:$0xff]   ;;  %v548_v56 = vpack.c.bf16 %v538_v36, %v536_v31  ;;  %s1084_s23 = smov [#allocation9]  }
 0x22b   :  { %v952_v41 = vld [vmem:[#allocation4 + $0x38] sm:$0xff]   ;;  %849 = vmatprep.subr.bf16.mxu0 %v951_v40  ;;  %v954_v43 = vld [vmem:[#allocation4 + $0x30] sm:$0xff]   ;;  %v955_v44 = vld [vmem:[#allocation4 + $0x68] sm:$0xff]   ;;  %s740_s24 = sshll.u32 %s1084_s23, 4  ;;  %s741_s24 = int_to_ptr.vmem [resolvable:$true] %s740_s24 }
 0x22c   :  { %716 = vmatprep.mubr.bf16.mxu0 %v549_v39  ;;  %850 = vmatpush3.bf16.msra.mxu0 %v952_v41  ;;  %v956_v45 = vld [vmem:[#allocation4 + $0x28] sm:$0xff]   ;;  %v957_v46 = vld [vmem:[#allocation4 + $0x60] sm:$0xff]   ;;  %v959_v48 = vld [vmem:[#allocation4 + $0x58] sm:$0xff]   ;;  %s1047_s25 = scalar_lea.vmem %s741_s24, 128  ;;  %p1052_p7 = scmp.lt.s32.totalorder %s741_s24, %s741_s24 }
 0x22d   :  { %851 = vmatprep.subr.bf16.mxu0 %v953_v42  ;;  %v958_v47 = vld [vmem:[#allocation4 + $0x20] sm:$0xff]   ;;  %v960_v49 = vld [vmem:[#allocation4 + $0x18] sm:$0xff]   ;;  %v961_v50 = vld [vmem:[#allocation4 + $0x50] sm:$0xff]   ;;  %p1048_p6 = scmp.ne.s32.totalorder %s741_s24, %s1047_s25  ;;  %p1053_p8 = scmp.lt.s32.totalorder %s1047_s25, %s1047_s25 }
 0x22e   :  { %v962_v51 = vld [vmem:[#allocation4 + $0x10] sm:$0xff]   ;;  %v963_v52 = vld [vmem:[#allocation4 + $0x48] sm:$0xff]   ;;  %v965_v54 = vld [vmem:[#allocation4 + $0x40] sm:$0xff]  }
 0x22f   :  { %v964_v53 = vld [vmem:[#allocation4 + $0x8] sm:$0xff]   ;;  %v966_v55 = vld [vmem:[#allocation4] sm:$0xff]   ;;  %p1054_p9 = por %p1053_p8, %p1052_p7 }
 0x230   :  { %852 = vmatpush3.bf16.msra.mxu0 %v954_v43  ;;  %v582_v57 = vld [vmem:[%s1184_s6] sm:$0x1] }
 0x231   :  { %853 = vmatprep.subr.bf16.mxu0 %v955_v44  ;;  %v583_v59 = vunpack.c.l.bf16 %v582_v57  ;;  %p1055_p10 = pnand %p1054_p9, %p1048_p6 }
 0x233   :  { %v587_v62 = vrot.slane %v583_v59, %v1146_v24 }
 0x234   :  { %854 = vmatpush3.bf16.msra.mxu0 %v956_v45 }
 0x235   :  { %855 = vmatprep.subr.bf16.mxu0 %v957_v46 }
 0x238   :  { %856 = vmatpush3.bf16.msra.mxu0 %v958_v47 }
 0x239   :  { %857 = vmatprep.subr.bf16.mxu0 %v959_v48 }
 0x23c   :  { %858 = vmatpush3.bf16.msra.mxu0 %v960_v49 }
 0x23d   :  { %859 = vmatprep.subr.bf16.mxu0 %v961_v50 }
 0x240   :  { %860 = vmatpush3.bf16.msra.mxu0 %v962_v51 }
 0x241   :  { %861 = vmatprep.subr.bf16.mxu0 %v963_v52 }
 0x244   :  { %862 = vmatpush3.bf16.msra.mxu0 %v964_v53 }
 0x245   :  { %863 = vmatprep.subr.bf16.mxu0 %v965_v54 }
 0x248   :  { %864 = vmatpush3.bf16.msra.mxu0 %v966_v55 }
 0x24b   :  { %717 = vmatmul.mubr.bf16.vlgmr.msra.gmra.mxu0 %v548_v56 }
 0x30b   :  { %v865_v58 = vpop.f32.mrf.mxu0 }
 0x30d   :  { %v866_v60 = vpop.f32.mrf.mxu0 }
 0x30e   :  { %v867_v63 = vadd.f32 %v866_v60, %v865_v58 }
 0x30f   :  { %v868_v61 = vpop.f32.mrf.mxu0 }
 0x310   :  { %v719_v2 = vadd.f32 %v867_v63, %v587_v62 }
 0x311   :  { %v869_v0 = vpop.f32.mrf.mxu0 }
 0x312   :  { %v870_v1 = vadd.f32 %v869_v0, %v868_v61 }
 0x314   :  { %v722_v3 = vadd.f32 %v870_v1, %v587_v62 }
 0x316   :  { %v847_v4 = vpack.c.bf16 %v722_v3, %v719_v2 }
 0x318   :  { %848 = vst [vmem:[#allocation9] sm:$0xff] %v847_v4  }
 0x319   :  { %1058 = shalt.err (!%p1055_p10)
}
 0x31a   :  { %746 = dma.vmem_to_hbm [thread:$0]  %s741_s24, 128, %s1185_s7, [#allocation8], %s1078_s27, %s1078_s27, %s1079_s28  }
 0x31b   :  { %1075 = dma.done.wait [#allocation8], 128  }
 0x31c   :  { %1076 = vsyncadd [#allocation8], 4294967168 }
 0x31d   :  { %750 = vsyncpa [#allocation7], 1 }
 0x31e   :  { %751 = vsyncpa [#allocation8], 1 }
 0x31f   :  { %752 = vsyncmov [#allocation5] }
 0x322   :  { %s753_s29 = vpop.sfrf %752 }
 0x323   :  { %p839_p11 = scmp.ne.s32.totalorder %s753_s29, 0 }
 0x325   :  { %757 = shalt.err (%p839_p11)  }
 0x326   :  { %759 = vsyncmov [#allocation5 + $0x1] }
 0x329   :  { %s760_s30 = vpop.sfrf %759 }
 0x32a   :  { %p840_p12 = scmp.ne.s32.totalorder %s760_s30, 0 }
 0x32c   :  { %764 = shalt.err (%p840_p12)  }
 0x32d   :  { %766 = vsyncmov [#allocation5 + $0x2] }
 0x330   :  { %s767_s8 = vpop.sfrf %766 }
 0x331   :  { %p841_p13 = scmp.ne.s32.totalorder %s767_s8, 0 }
 0x333   :  { %771 = shalt.err (%p841_p13)  }

</bundles_post_ra>
